<compile_context>
chip_gen: v7x
topology: tpu7x:2x2x1
jax: 0.10.0
libtpu: 0.0.40
codegen_flags: <defaults>
</compile_context>

<pallas_src>
import jax
import jax.numpy as jnp
from jax.experimental import pallas as pl
from jax.experimental.pallas import tpu as pltpu


def relu_skip_kernel(x_ref, w1_ref, a_ref, ws_ref, y_ref):
    # x_ref:  (block_n, d)   f32, streamed X row-tile
    # w1_ref: (d, m)         bf16, resident hidden weight (W_relu^T)
    # a_ref:  (1, m)         f32, resident alpha_relu row (lane-major)
    # ws_ref: (1, d)         f32, resident skip row, pre-scaled by alpha_skip
    # y_ref:  (1, 1, block_n) lane-dense output row for this tile
    x = x_ref[...]                                          # f32 (block_n, d)

    # Hidden path on the MXU: bf16 operands, f32 accumulate.  ReLU on the VPU.
    xu = jnp.dot(
        x.astype(jnp.bfloat16),
        w1_ref[...].astype(jnp.bfloat16),
        preferred_element_type=jnp.float32,
    )                                                       # (block_n, m) f32
    xu = jnp.maximum(xu, 0.0)

    # Epilogue: VPU broadcast-multiply + lane reduction (no MXU mat-vecs).
    y_relu = jnp.sum(xu * a_ref[...], axis=-1, keepdims=True)   # (block_n, 1)
    y_skip = jnp.sum(x * ws_ref[...], axis=-1, keepdims=True)   # (block_n, 1)
    y_col = y_relu + y_skip                                      # (block_n, 1)

    # Lane-dense store: one XLU transpose, then a single unmasked row store.
    y_row = jnp.transpose(y_col, (1, 0))                         # (1, block_n)
    y_ref[0] = y_row.astype(y_ref.dtype)


def relu_skip_forward(x, w_relu_t, alpha_relu_t, w_skip_t, alpha_skip, *, block_n=512):
    """x: (N, d), w_relu_t: (d, m), alpha_relu_t: (m, 1), w_skip_t: (d, 1),
    alpha_skip: scalar  ->  y: (N, 1)."""
    N, d = x.shape
    m = w_relu_t.shape[1]
    block_n = min(block_n, N)
    assert N % block_n == 0, "demo wrapper assumes block_n divides N"
    num_tiles = N // block_n

    # Lane-major parameter rows; fold the 1x1 alpha_skip Linear into w_skip.
    a_row = alpha_relu_t.reshape(1, m).astype(jnp.float32)              # (1, m)
    ws_row = (w_skip_t.reshape(1, d) * alpha_skip).astype(jnp.float32)  # (1, d)
    # bf16 resident weight: full MXU rate + half the VMEM footprint.
    w1_bf16 = w_relu_t.astype(jnp.bfloat16)                             # (d, m)

    # 3-D output so the last two block dims equal the array dims (lane-dense,
    # layout-legal on all generations); reshaped to (N, 1) below.
    y_rows = pl.pallas_call(
        relu_skip_kernel,
        out_shape=jax.ShapeDtypeStruct((num_tiles, 1, block_n), x.dtype),
        grid_spec=pltpu.PrefetchScalarGridSpec(
            num_scalar_prefetch=0,
            grid=(num_tiles,),
            in_specs=[
                pl.BlockSpec((block_n, d), lambda i: (i, 0)),  # X: streamed tile
                pl.BlockSpec((d, m), lambda i: (0, 0)),        # W_relu^T: resident
                pl.BlockSpec((1, m), lambda i: (0, 0)),        # alpha_relu row: resident
                pl.BlockSpec((1, d), lambda i: (0, 0)),        # scaled skip row: resident
            ],
            out_specs=pl.BlockSpec((1, 1, block_n), lambda i: (i, 0, 0)),
        ),
        compiler_params=pltpu.CompilerParams(
            # Row tiles are independent -> parallel (2-TC sharding on v7x).
            dimension_semantics=("parallel",),
            # Tiny working set: bf16 W (d*m*2B) + double-buffered X tiles.
            vmem_limit_bytes=32 * 1024 * 1024,
        ),
    )(x, w1_bf16, a_row, ws_row)

    return y_rows.reshape(N, 1)


def relu_skip_reference_f32(x, w_relu_t, alpha_relu_t, w_skip_t, alpha_skip):
    """Pure-f32 reference (matches the PyTorch module semantics)."""
    xu = jnp.maximum(x @ w_relu_t, 0.0)
    return xu @ alpha_relu_t + (x @ w_skip_t) * alpha_skip


def relu_skip_reference_matched(x, w_relu_t, alpha_relu_t, w_skip_t, alpha_skip):
    """Reference with the same bf16-dot / f32-epilogue arithmetic as the kernel."""
    a_row = alpha_relu_t.reshape(1, -1).astype(jnp.float32)
    ws_row = (w_skip_t.reshape(1, -1) * alpha_skip).astype(jnp.float32)
    xu = jnp.dot(
        x.astype(jnp.bfloat16),
        w_relu_t.astype(jnp.bfloat16),
        preferred_element_type=jnp.float32,
    )
    xu = jnp.maximum(xu, 0.0)
    y_relu = jnp.sum(xu * a_row, axis=-1, keepdims=True)
    y_skip = jnp.sum(x * ws_row, axis=-1, keepdims=True)
    return y_relu + y_skip


if __name__ == "__main__":
    # Small, lane/sublane-aligned shapes: N samples of dimension d, hidden m.
    # (n from the module signature is unused by the forward pass.)
    N, d, m = 512, 128, 256

    key = jax.random.PRNGKey(0)
    kx, kw1, ka, kws, kas = jax.random.split(key, 5)

    x = jax.random.normal(kx, (N, d), dtype=jnp.float32)
    # Parameters with nn.Linear-like scaling, stored pre-transposed.
    w_relu_t = jax.random.normal(kw1, (d, m), dtype=jnp.float32) * (1.0 / jnp.sqrt(d))
    alpha_relu_t = jax.random.normal(ka, (m, 1), dtype=jnp.float32) * (1.0 / jnp.sqrt(m))
    w_skip_t = jax.random.normal(kws, (d, 1), dtype=jnp.float32) * (1.0 / jnp.sqrt(d))
    alpha_skip = jax.random.normal(kas, (), dtype=jnp.float32)  # Linear(1,1) weight

    # block_n=128 keeps several grid steps at this small demo N; for
    # production N use the default 512 (or sweep 512-1024).
    y = jax.block_until_ready(
        relu_skip_forward(x, w_relu_t, alpha_relu_t, w_skip_t, alpha_skip, block_n=128)
    )

    y_matched = relu_skip_reference_matched(x, w_relu_t, alpha_relu_t, w_skip_t, alpha_skip)
    y_f32 = relu_skip_reference_f32(x, w_relu_t, alpha_relu_t, w_skip_t, alpha_skip)

    assert y.shape == (N, 1)
    # Tight check vs a reference using the same bf16-dot arithmetic.
    assert jnp.allclose(y, y_matched, atol=1e-3, rtol=1e-3), "mismatch vs matched reference"
    # Looser check vs the pure-f32 PyTorch-equivalent reference (bf16 MXU operands).
    assert jnp.allclose(y, y_f32, atol=2e-2, rtol=2e-2), "mismatch vs f32 reference"
    print("KERNEL_OK")
</pallas_src>

<mosaic_0001>
module attributes {stable_mosaic.version = 11 : i64} {
  func.func @relu_skip_kernel(%arg0: i32, %arg1: memref<128x128xf32, #tpu.memory_space<vmem>>, %arg2: memref<128x256xbf16, #tpu.memory_space<vmem>>, %arg3: memref<1x256xf32, #tpu.memory_space<vmem>>, %arg4: memref<1x128xf32, #tpu.memory_space<vmem>>, %arg5: memref<1x1x128xf32, #tpu.memory_space<vmem>>) attributes {dimension_semantics = [#tpu.dimension_semantics<parallel>], iteration_bounds = array<i64: 4>, scalar_prefetch = 0 : i64, scratch_operands = 0 : i64, tpu.core_type = #tpu.core_type<tc>, window_params = [{transform_indices = @transform_0, window_bounds = array<i64: 128, 128>}, {pipeline_mode = #tpu.pipeline_mode<synchronous>, transform_indices = @transform_1, window_bounds = array<i64: 128, 256>}, {pipeline_mode = #tpu.pipeline_mode<synchronous>, transform_indices = @transform_2, window_bounds = array<i64: 1, 256>}, {pipeline_mode = #tpu.pipeline_mode<synchronous>, transform_indices = @transform_3, window_bounds = array<i64: 1, 128>}, {transform_indices = @transform_4, window_bounds = array<i64: 1, 1, 128>}]} {
    %c0 = arith.constant 0 : index
    %c0_0 = arith.constant 0 : index
    %0 = vector.load %arg1[%c0, %c0_0] : memref<128x128xf32, #tpu.memory_space<vmem>>, vector<128x128xf32>
    %1 = arith.truncf %0 : vector<128x128xf32> to vector<128x128xbf16>
    %c0_1 = arith.constant 0 : index
    %c0_2 = arith.constant 0 : index
    %2 = vector.load %arg2[%c0_1, %c0_2] : memref<128x256xbf16, #tpu.memory_space<vmem>>, vector<128x256xbf16>
    %cst = arith.constant dense<0.000000e+00> : vector<128x256xf32>
    %3 = tpu.matmul %1, %2, %cst {dimension_numbers = #tpu.dot_dimension_numbers<[1], [0], [0], [1], [0, 0, 1, 1], [], []>} : vector<128x128xbf16>, vector<128x256xbf16>, vector<128x256xf32> -> vector<128x256xf32>
    %cst_3 = arith.constant 0.000000e+00 : f32
    %4 = vector.broadcast %cst_3 : f32 to vector<128x256xf32>
    %5 = arith.maximumf %3, %4 : vector<128x256xf32>
    %c0_4 = arith.constant 0 : index
    %c0_5 = arith.constant 0 : index
    %6 = vector.load %arg3[%c0_4, %c0_5] : memref<1x256xf32, #tpu.memory_space<vmem>>, vector<1x256xf32>
    %7 = vector.broadcast %6 : vector<1x256xf32> to vector<128x256xf32>
    %8 = arith.mulf %5, %7 : vector<128x256xf32>
    %cst_6 = arith.constant dense<0.000000e+00> : vector<128xf32>
    %9 = vector.multi_reduction <add>, %8, %cst_6 [1] : vector<128x256xf32> to vector<128xf32>
    %10 = vector.shape_cast %9 : vector<128xf32> to vector<128x1xf32>
    %c0_7 = arith.constant 0 : index
    %c0_8 = arith.constant 0 : index
    %11 = vector.load %arg4[%c0_7, %c0_8] : memref<1x128xf32, #tpu.memory_space<vmem>>, vector<1x128xf32>
    %12 = vector.broadcast %11 : vector<1x128xf32> to vector<128x128xf32>
    %13 = arith.mulf %0, %12 : vector<128x128xf32>
    %cst_9 = arith.constant dense<0.000000e+00> : vector<128xf32>
    %14 = vector.multi_reduction <add>, %13, %cst_9 [1] : vector<128x128xf32> to vector<128xf32>
    %15 = vector.shape_cast %14 : vector<128xf32> to vector<128x1xf32>
    %16 = arith.addf %10, %15 : vector<128x1xf32>
    %17 = tpu.transpose %16, [1, 0] : vector<128x1xf32> -> vector<1x128xf32>
    %c0_10 = arith.constant 0 : index
    %c0_11 = arith.constant 0 : index
    %c0_12 = arith.constant 0 : index
    %18 = vector.load %arg5[%c0_10, %c0_11, %c0_12] : memref<1x1x128xf32, #tpu.memory_space<vmem>>, vector<1x1x128xf32>
    %19 = vector.shape_cast %18 : vector<1x1x128xf32> to vector<1x128xf32>
    %20 = vector.shape_cast %17 : vector<1x128xf32> to vector<1x1x128xf32>
    tpu.vector_store %arg5[%c0_10, %c0_11, %c0_12], %20 {strides = array<i32>} : memref<1x1x128xf32, #tpu.memory_space<vmem>>, vector<1x1x128xf32>,
    return
  }
  func.func @transform_0(%arg0: i32) -> (i32, i32) {
    %c0_i32 = arith.constant 0 : i32
    %c0_i32_0 = arith.constant 0 : i32
    return %arg0, %c0_i32 : i32, i32
  }
  func.func @transform_1(%arg0: i32) -> (i32, i32) {
    %c0_i32 = arith.constant 0 : i32
    %c0_i32_0 = arith.constant 0 : i32
    %c0_i32_1 = arith.constant 0 : i32
    return %c0_i32, %c0_i32_0 : i32, i32
  }
  func.func @transform_2(%arg0: i32) -> (i32, i32) {
    %c0_i32 = arith.constant 0 : i32
    %c0_i32_0 = arith.constant 0 : i32
    %c0_i32_1 = arith.constant 0 : i32
    return %c0_i32, %c0_i32_0 : i32, i32
  }
  func.func @transform_3(%arg0: i32) -> (i32, i32) {
    %c0_i32 = arith.constant 0 : i32
    %c0_i32_0 = arith.constant 0 : i32
    %c0_i32_1 = arith.constant 0 : i32
    return %c0_i32, %c0_i32_0 : i32, i32
  }
  func.func @transform_4(%arg0: i32) -> (i32, i32, i32) {
    %c0_i32 = arith.constant 0 : i32
    %c0_i32_0 = arith.constant 0 : i32
    %c0_i32_1 = arith.constant 0 : i32
    return %arg0, %c0_i32, %c0_i32_0 : i32, i32, i32
  }
}

</mosaic_0001>

<bundles_post_ra>
// kernel: tpu_custom_call.1
= control target key start
LH: loop header
LB: loop body
LE: loop exit
PB: predicated region body
PF: predicated region fallthrough
CT: control target
= control target key end

     0   :  { %9 = vsyncpa [#allocation3], 0  ;;  %s1388_s0 = inlined_call_operand.hbm [shape: f32[512,128], index: 0, kind: input, shape index: {}]   ;;  %s1389_s1 = inlined_call_operand.hbm [shape: bf16[128,256], index: 1, kind: input, shape index: {}]   ;;  %s1390_s2 = inlined_call_operand.vmem [shape: f32[1,256], index: 2, kind: input, shape index: {}]   ;;  %s1391_s3 = inlined_call_operand.vmem [shape: f32[1,128], index: 3, kind: input, shape index: {}]   ;;  %s1392_s4 = inlined_call_operand.hbm [shape: f32[4,1,128], index: 4, kind: output, shape index: {}]  }
   0x1   :  { %11 = vsyncpa [#allocation3 + $0x1], 0 }
   0x2   :  { %12 = vsyncpa [#allocation6], 0 }
   0x3   :  { %13 = vsyncpa [#allocation4], 0 }
   0x4   :  { %15 = vsyncpa [#allocation4 + $0x1], 0  ;;  %s1074_s15 = smov 0   ;;  %s1076_s16 = smov 0  }
   0x5   :  { %s1078_s17 = smov 0   ;;  %s1080_s18 = smov 0  }
   0x6 LB: > { %s1095_s19 = sadd.s32 4294967295, %s1041_s18   ;;  %s782_s20 = sadd.s32 4294967294, %s1041_s18   ;;  %s1041_s18 = sphi %s1080_s18, %s1411_s18   ;;  %s1037_s17 = sphi %s1078_s17, %s1410_s17   ;;  %s1033_s16 = sphi %s1076_s16, %s1409_s16   ;;  %s1029_s15 = sphi %s1074_s15, %s1408_s15  }
   0x7   : > { %p41_p0 = scmp.ne.s32.totalorder %s1033_s16, %s1029_s15  ;;  %p1393_p1 = scmp.eq.s32.totalorder %s1095_s19, 0 }
   0x8   : > { %p134_p3 = scmp.eq.s32.totalorder %s782_s20, 3  ;;  %p783_p5 = scmp.ge.s32.totalorder %s1041_s18, 1 }
   0x9   : > { %p1104_p4 = por %p1393_p1, %p41_p0  ;;  %p141_p7 = scmp.lt.s32.totalorder %s1041_s18, 5 }
   0xa   : > { %p1109_p6 = por %p134_p3, %p41_p0  ;;  %s1043_s24 = smov [#allocation5]  }
   0xb   : > { %s1396_s21 = scalar_select %p1104_p4, 1, 0 }
   0xc   : > { %s1397_s22 = scalar_select %p1109_p6, 1, 0 }
   0xd   : > { %p1114_p8 = pnand %p783_p5, %p141_p7  ;;  %s153_s25 = sshll.u32 %s1043_s24, 4  ;;  %s154_s25 = int_to_ptr.vmem [resolvable:$true] %s153_s25 }
   0xe   : > { %s1127_s27 = sadd.s32 1, %s1041_s18   ;;  %s28_s28 = sadd.s32 1, %s1037_s17 }
   0xf   : > { %s1398_s23 = scalar_select %p1114_p8, 1, 0 }
  0x10   : > { %p837_p9 = pneg %p1114_p8  ;;  %s25_s29 = ssub.s32 %s1041_s18, %s1127_s27 }
  0x11   : > { %s913_s6 = scalar_lea.hbm %s1389_s1, 2048 }
  0x12   : > { %p1122_p10 = pnand %p837_p9, %p1393_p1  ;;  %p914_p11 = scmp.ne.s32.totalorder %s1389_s1, %s913_s6 }
  0x13   : > { %p920_p3 = scmp.lt.u32.totalorder %s913_s6, %s1389_s1 }
  0x14   : > { %p915_p12 = pneg %p1122_p10 }
  0x16   : > { %p916_p13 = pnand %p915_p12, %p914_p11 }
  0x18   : > { %p917_p0 = pneg %p916_p13 }
  0x1a   : > { %p922_p5 = pnand %p920_p3, %p917_p0 }
  0x1c   : > { %925 = shalt.err (!%p922_p5)
}
  0x1d   : > { %s926_s11 = scalar_lea.vmem %s154_s25, 2048  ;;  %p934_p2 = scmp.lt.s32.totalorder %s154_s25, %s154_s25 }
  0x1e   : > { %p927_p7 = scmp.ne.s32.totalorder %s154_s25, %s926_s11  ;;  %p935_p6 = scmp.lt.s32.totalorder %s926_s11, %s926_s11 }
  0x20   : > { %p929_p9 = pnand %p927_p7, %p915_p12  ;;  %p936_p4 = por %p935_p6, %p934_p2 }
  0x22   : > { %p930_p1 = pneg %p929_p9 }
  0x24   : > { %p937_p8 = pnand %p936_p4, %p930_p1 }
  0x26   : > { %940 = shalt.err (!%p937_p8)
}
  0x27   : > { %s1044_s12 = smov 128   ;;  %s1045_s13 = smov 8  }
  0x28   : > { %840 = dma.hbm_to_vmem [thread:$0]  (!%p1122_p10), %s1389_s1, 2048, %s154_s25, [#allocation6], %s1044_s12, %s1044_s12, %s1045_s13  }
  0x29   : > { %p26_p1 = scmp.eq.s32.totalorder %s25_s29, 0  ;;  %p35_p2 = scmp.ne.s32.totalorder %s1037_s17, %s1033_s16 }
  0x2a   : > { %p36_p4 = scmp.eq.s32.totalorder %s1041_s18, 0  ;;  %p850_p6 = scmp.lt.s32.totalorder %s1041_s18, 4 }
  0x2b   : > { %s1156_s24 = scalar_select %p26_p1, %s1037_s17, %s28_s28  }
  0x2c   : > { %p37_p8 = por %p36_p4, %p35_p2  ;;  %p1400_p11 = scmp.eq.s32.totalorder %s1095_s19, 3 }
  0x2d   : > { %s173_s26 = sand.u32 1, %s1037_s17   ;;  %s812_s5 = sshll.u32 %s1041_s18, 11 }
  0x2e   : > { %p1160_p12 = por %p1400_p11, %p35_p2  ;;  %s786_s6 = sshll.u32 %s173_s26, 7 }
  0x2f   : > { %s1169_s9 = scalar_lea.hbm %s1388_s0, %s812_s5  ;;  %s177_s25 = scalar_lea.vmem [#allocation2], %s786_s6 }
  0x30   : > { %s184_s28 = sshll.u32 %s177_s25, 4  ;;  %p1171_p10 = pnand %p850_p6, %p37_p8  ;;  %s1175_s28 = int_to_ptr.vmem [resolvable:$true] %s184_s28 }
  0x31   : > { %s1177_s10 = scalar_lea.sflag [#allocation3], %s173_s26  ;;  %s941_s11 = scalar_lea.hbm %s1169_s9, 2048 }
  0x32   : > { %p942_p13 = scmp.ne.s32.totalorder %s1169_s9, %s941_s11  ;;  %p943_p0 = pneg %p1171_p10 }
  0x33   : > { %s946_s5 = scalar_lea.hbm %s1388_s0, 8192  ;;  %p947_p7 = scmp.lt.u32.totalorder %s1169_s9, %s1388_s0 }
  0x34   : > { %p944_p3 = pnand %p943_p0, %p942_p13  ;;  %p948_p9 = scmp.lt.u32.totalorder %s946_s5, %s941_s11 }
  0x35   : > { %p950_p2 = scmp.lt.u32.totalorder %s941_s11, %s1169_s9 }
  0x36   : > { %p945_p5 = pneg %p944_p3  ;;  %p949_p1 = por %p948_p9, %p947_p7 }
  0x38   : > { %p951_p4 = por %p950_p2, %p949_p1 }
  0x3a   : > { %p952_p6 = pnand %p951_p4, %p945_p5 }
  0x3c   : > { %955 = shalt.err (!%p952_p6)
}
  0x3d   : > { %s956_s26 = scalar_lea.vmem %s1175_s28, 2048  ;;  %s1046_s8 = smov [#allocation2]  }
  0x3e   : > { %p957_p8 = scmp.ne.s32.totalorder %s1175_s28, %s956_s26  ;;  %s961_s25 = sshll.u32 %s1046_s8, 4  ;;  %s962_s25 = int_to_ptr.vmem [resolvable:$false] %s961_s25 }
  0x3f   : > { %s963_s14 = scalar_lea.vmem %s962_s25, 4096  ;;  %p964_p3 = scmp.lt.s32.totalorder %s1175_s28, %s962_s25 }
  0x40   : > { %p959_p11 = pnand %p957_p8, %p943_p0  ;;  %p965_p7 = scmp.lt.s32.totalorder %s963_s14, %s956_s26 }
  0x42   : > { %p960_p13 = pneg %p959_p11  ;;  %p966_p9 = por %p965_p7, %p964_p3 }
  0x44   : > { %p967_p1 = pnand %p966_p9, %p960_p13 }
  0x46   : > { %970 = shalt.err (!%p967_p1)
}
  0x47   : > { %844 = dma.hbm_to_vmem [thread:$0]  (!%p1171_p10), %s1169_s9, 2048, %s1175_s28, %s1177_s10, %s1044_s12, %s1044_s12, %s1045_s13  }
  0x48   : > { %p1403_p0 = scmp.ne.s32.totalorder %s1398_s23, 0 }
  0x49   : > { %s1211_s11 = sand.u32 (!%p1403_p0), 1, %s1033_s16   ;;  %p1404_p5 = scmp.ne.s32.totalorder (!%p1403_p0), %s1396_s21, 0 }
  0x4a   : > { %196 = sbr.rel (%p1403_p0) target bundleno = 649 (0x289), region = 36  ;;  %s790_s20 = sshll.u32 (!%p1403_p0), %s1211_s11, 7 }
  0x4b   : > { %s199_s5 = scalar_lea.sflag (!%p1403_p0), [#allocation3], %s1211_s11  ;;  %s1215_s6 = scalar_lea.vmem (!%p1403_p0), [#allocation2], %s790_s20 }
  0x51   : > { %1016 = dma.done.wait (%p1404_p5), %s199_s5, 2048  }
  0x52   : > { %1018 = vsyncadd (%p1404_p5), %s199_s5, 4294965248  ;;  %p1405_p10 = scmp.eq.s32.totalorder %s1095_s19, 0 }
  0x54   : > { %1020 = dma.done.wait (%p1405_p10), [#allocation6], 2048   ;;  %p1406_p2 = pmov %p1405_p10 }
  0x55   : > { %v1047_v0 = vmov 0   ;;  %v889_v1 = vld [vmem:[#allocation5 + $0x4] ss:$8 sps:$4 sm:$0xff]   ;;  %v891_v2 = vld [vmem:[#allocation5] ss:$8 sps:$4 sm:$0xff]   ;;  %v234_v17 = vld [vmem:[%s1215_s6 + $0x10] sm:$0xff]  ;;  %v499_v51 = vlaneseq }
  0x56   : > { %1022 = vsyncadd (%p1406_p2), [#allocation6], 4294965248  ;;  %384 = vmatprep.mubr.bf16.mxu0 %v1047_v0  ;;  %424 = vmatprep.mubr.bf16.mxu1 %v1047_v0  ;;  %v892_v3 = vld [vmem:[#allocation5 + $0x14] ss:$8 sps:$4 sm:$0xff]   ;;  %v894_v4 = vld [vmem:[#allocation5 + $0x10] ss:$8 sps:$4 sm:$0xff]  }
  0x57   : > { %352 = vmatprep.subr.bf16.mxu0 %v889_v1  ;;  %813 = vmatprep.subr.bf16.mxu1 %v889_v1  ;;  %v895_v5 = vld [vmem:[#allocation5 + $0x24] ss:$8 sps:$4 sm:$0xff]   ;;  %v897_v6 = vld [vmem:[#allocation5 + $0x20] ss:$8 sps:$4 sm:$0xff]   ;;  %v898_v7 = vld [vmem:[#allocation5 + $0x34] ss:$8 sps:$4 sm:$0xff]  }
  0x58   : > { %353 = vmatpush1.bf16.msra.mxu0 %v891_v2  ;;  %821 = vmatpush1.bf16.msra.mxu1 %v891_v2  ;;  %v900_v8 = vld [vmem:[#allocation5 + $0x30] ss:$8 sps:$4 sm:$0xff]   ;;  %v901_v9 = vld [vmem:[#allocation5 + $0x44] ss:$8 sps:$4 sm:$0xff]   ;;  %v903_v10 = vld [vmem:[#allocation5 + $0x40] ss:$8 sps:$4 sm:$0xff]  }
  0x59   : > { %354 = vmatprep.subr.bf16.mxu0 %v892_v3  ;;  %814 = vmatprep.subr.bf16.mxu1 %v892_v3  ;;  %v904_v11 = vld [vmem:[#allocation5 + $0x54] ss:$8 sps:$4 sm:$0xff]   ;;  %v233_v12 = vld [vmem:[%s1215_s6 + $0x8] sm:$0xff]  ;;  %v1231_v13 = vld [vmem:[%s1391_s3] ss:$0 sm:$0xff]  ;;  %v500_v52 = vshrl.u32 %v499_v51, 7 }
  0x5a   : > { %v597_v14 = vmul.f32 %v1231_v13, %v233_v12  ;;  %v906_v15 = vld [vmem:[#allocation5 + $0x50] ss:$8 sps:$4 sm:$0xff]   ;;  %v907_v16 = vld [vmem:[#allocation5 + $0x64] ss:$8 sps:$4 sm:$0xff]   ;;  %v598_v18 = vmul.f32 %v1231_v13, %v234_v17  ;;  %v909_v19 = vld [vmem:[#allocation5 + $0x60] ss:$8 sps:$4 sm:$0xff]  }
  0x5b   : > { %v910_v20 = vld [vmem:[#allocation5 + $0x74] ss:$8 sps:$4 sm:$0xff]   ;;  %v912_v23 = vld [vmem:[#allocation5 + $0x70] ss:$8 sps:$4 sm:$0xff]   ;;  %v232_v24 = vld [vmem:[%s1215_s6] sm:$0xff]  ;;  %v501_v53 = vsub.s32 0, %v500_v52 }
  0x5c   : > { %355 = vmatpush1.bf16.msra.mxu0 %v894_v4  ;;  %822 = vmatpush1.bf16.msra.mxu1 %v894_v4  ;;  %v235_v21 = vld [vmem:[%s1215_s6 + $0x18] sm:$0xff]  ;;  %v240_v25 = vld [vmem:[%s1215_s6 + $0x40] sm:$0xff]  ;;  %v1241_v26 = vld [vmem:[%s1215_s6 + $0x48] sm:$0xff]  ;;  %v248_v29 = vpack.c.bf16 %v233_v12, %v232_v24  ;;  %v596_v49 = vmul.f32 %v1231_v13, %v232_v24  ;;  %v505_v55 = vsub.s32 1, %v500_v52  ;;  %s229_s9 = scalar_lea.vmem [#allocation7], %s1211_s11  ;;  %s809_s29 = sshll.u32 %s1095_s19, 4 }
  0x5d   : > { %356 = vmatprep.subr.bf16.mxu0 %v895_v5  ;;  %815 = vmatprep.subr.bf16.mxu1 %v895_v5  ;;  %v599_v22 = vmul.f32 %v1231_v13, %v235_v21  ;;  %v236_v27 = vld [vmem:[%s1215_s6 + $0x20] sm:$0xff]  ;;  %v252_v30 = vpack.c.bf16 %v1241_v26, %v240_v25  ;;  %v237_v31 = vld [vmem:[%s1215_s6 + $0x28] sm:$0xff]  ;;  %v1251_v33 = vld [vmem:[%s1215_s6 + $0x50] sm:$0xff]  ;;  %v249_v37 = vpack.c.bf16 %v235_v21, %v234_v17  ;;  %s706_s28 = sshll.u32 %s229_s9, 4  ;;  %s1347_s26 = scalar_lea.hbm %s1392_s4, %s809_s29  ;;  %s1342_s28 = int_to_ptr.vmem [resolvable:$true] %s706_s28 }
  0x5e   : > { %614 = vadd.xlane.f32.xlu1 %v597_v14  ;;  %v600_v28 = vmul.f32 %v1231_v13, %v236_v27  ;;  %v601_v32 = vmul.f32 %v1231_v13, %v237_v31  ;;  %v1254_v34 = vld [vmem:[%s1215_s6 + $0x58] sm:$0xff]  ;;  %v238_v35 = vld [vmem:[%s1215_s6 + $0x30] sm:$0xff]  ;;  %v1263_v39 = vld [vmem:[%s1215_s6 + $0x60] sm:$0xff]  ;;  %v250_v41 = vpack.c.bf16 %v237_v31, %v236_v27  ;;  %612 = vadd.xlane.f32.xlu0 %v596_v49  ;;  %s694_s8 = scalar_lea.sflag [#allocation4], %s1211_s11  ;;  %s971_s25 = scalar_lea.vmem %s1342_s28, 16 }
  0x5f   : > { %v602_v36 = vmul.f32 %v1231_v13, %v238_v35  ;;  %v253_v38 = vpack.c.bf16 %v1254_v34, %v1251_v33  ;;  %v1266_v40 = vld [vmem:[%s1215_s6 + $0x68] sm:$0xff]  ;;  %v239_v43 = vld [vmem:[%s1215_s6 + $0x38] sm:$0xff]  ;;  %v1274_v44 = vld [vmem:[%s1215_s6 + $0x70] sm:$0xff]  ;;  %v604_v50 = vmul.f32 %v1231_v13, %v240_v25  ;;  %p972_p4 = scmp.ne.s32.totalorder %s1342_s28, %s971_s25  ;;  %s1048_s14 = smov [#allocation7]  }
  0x60   : > { %357 = vmatpush1.bf16.msra.mxu0 %v897_v6  ;;  %823 = vmatpush1.bf16.msra.mxu1 %v897_v6  ;;  %v254_v42 = vpack.c.bf16 %v1266_v40, %v1263_v39  ;;  %v1277_v45 = vld [vmem:[%s1215_s6 + $0x78] sm:$0xff]  ;;  %v251_v46 = vpack.c.bf16 %v239_v43, %v238_v35  ;;  %v603_v48 = vmul.f32 %v1231_v13, %v239_v43  ;;  %v497_v54 = vld [vmem:[%s1390_s2] sm:$0x3]  ;;  %s975_s19 = sshll.u32 %s1048_s14, 4  ;;  %s976_s19 = int_to_ptr.vmem [resolvable:$false] %s975_s19 }
  0x61   : > { %358 = vmatprep.subr.bf16.mxu0 %v898_v7  ;;  %816 = vmatprep.subr.bf16.mxu1 %v898_v7  ;;  %v255_v47 = vpack.c.bf16 %v1277_v45, %v1274_v44  ;;  %v1287_v56 = vrot.slane %v497_v54, %v501_v53  ;;  %v1289_v58 = vrot.slane %v497_v54, %v505_v55  ;;  %p973_p6 = pnand %p972_p4, %p1160_p12  ;;  %s977_s20 = scalar_lea.vmem %s976_s19, 32 }
  0x62   : > { %616 = vadd.xlane.f32.xlu1 %v598_v18  ;;  %p978_p11 = scmp.lt.s32.totalorder %s1342_s28, %s976_s19  ;;  %p979_p13 = scmp.lt.s32.totalorder %s977_s20, %s971_s25 }
  0x63   : > { %p974_p8 = pneg %p973_p6 }
  0x64   : > { %359 = vmatpush1.bf16.msra.mxu0 %v900_v8  ;;  %824 = vmatpush1.bf16.msra.mxu1 %v900_v8  ;;  %p980_p3 = por %p979_p13, %p978_p11 }
  0x65   : > { %360 = vmatprep.subr.bf16.mxu0 %v901_v9  ;;  %817 = vmatprep.subr.bf16.mxu1 %v901_v9 }
  0x66   : > { %618 = vadd.xlane.f32.xlu1 %v599_v22  ;;  %p981_p7 = pnand %p980_p3, %p974_p8 }
  0x68   : > { %361 = vmatpush1.bf16.msra.mxu0 %v903_v10  ;;  %825 = vmatpush1.bf16.msra.mxu1 %v903_v10 }
  0x69   : > { %362 = vmatprep.subr.bf16.mxu0 %v904_v11  ;;  %818 = vmatprep.subr.bf16.mxu1 %v904_v11 }
  0x6a   : > { %620 = vadd.xlane.f32.xlu1 %v600_v28 }
  0x6c   : > { %363 = vmatpush1.bf16.msra.mxu0 %v906_v15  ;;  %826 = vmatpush1.bf16.msra.mxu1 %v906_v15 }
  0x6d   : > { %364 = vmatprep.subr.bf16.mxu0 %v907_v16  ;;  %819 = vmatprep.subr.bf16.mxu1 %v907_v16 }
  0x6e   : > { %622 = vadd.xlane.f32.xlu1 %v601_v32 }
  0x70   : > { %365 = vmatpush1.bf16.msra.mxu0 %v909_v19  ;;  %827 = vmatpush1.bf16.msra.mxu1 %v909_v19 }
  0x71   : > { %366 = vmatprep.subr.bf16.mxu0 %v910_v20  ;;  %820 = vmatprep.subr.bf16.mxu1 %v910_v20 }
  0x72   : > { %624 = vadd.xlane.f32.xlu1 %v602_v36  ;;  %v605_v36 = vmul.f32 %v1231_v13, %v1241_v26  ;;  %v606_v26 = vmul.f32 %v1231_v13, %v1251_v33 }
  0x74   : > { %367 = vmatpush1.bf16.msra.mxu0 %v912_v23  ;;  %828 = vmatpush1.bf16.msra.mxu1 %v912_v23 }
  0x76   : > { %626 = vadd.xlane.f32.xlu1 %v603_v48 }
  0x77   : > { %385 = vmatmul.mubr.bf16.vlgmr.msra.gmra.mrb[0].mxu0 %v248_v29  ;;  %425 = vmatmul.mubr.bf16.vlgmr.msra.gmra.mrb[0].mxu1 %v252_v30 }
  0x78   : > { %394 = vmatprep.mubr.bf16.mxu0 %v1047_v0  ;;  %434 = vmatprep.mubr.bf16.mxu1 %v1047_v0 }
  0x7a   : > { %628 = vadd.xlane.f32.xlu1 %v604_v50 }
  0x7f   : > { %395 = vmatmul.mubr.bf16.gmra.mrb[4].mxu0 %v249_v37  ;;  %435 = vmatmul.mubr.bf16.gmra.mrb[4].mxu1 %v253_v38 }
  0x80   : > { %404 = vmatprep.mubr.bf16.mxu0 %v1047_v0  ;;  %444 = vmatprep.mubr.bf16.mxu1 %v1047_v0 }
  0x87   : > { %405 = vmatmul.mubr.bf16.gmra.mrb[8].mxu0 %v250_v41  ;;  %445 = vmatmul.mubr.bf16.gmra.mrb[8].mxu1 %v254_v42 }
  0x88   : > { %414 = vmatprep.mubr.bf16.mxu0 %v1047_v0  ;;  %454 = vmatprep.mubr.bf16.mxu1 %v1047_v0 }
  0x8f   : > { %415 = vmatmul.mubr.bf16.gmra.mrb[12].mxu0 %v251_v46  ;;  %455 = vmatmul.mubr.bf16.gmra.mrb[12].mxu1 %v255_v47 }
 0x14a   : > { %v386_v57 = vpop.f32.mrb[0].mxu0  ;;  %v426_v59 = vpop.f32.mrb[0].mxu1 }
 0x14b   : > { %v465_v60 = vmax.f32 %v386_v57, 0.0  ;;  %v388_v61 = vpop.f32.mrb[1].mxu0  ;;  %v481_v62 = vmax.f32 %v426_v59, 0.0  ;;  %v428_v63 = vpop.f32.mrb[1].mxu1 }
 0x14c   : > { %v466_v0 = vmax.f32 %v388_v61, 0.0  ;;  %v482_v1 = vmax.f32 %v428_v63, 0.0  ;;  %v390_v2 = vpop.f32.mrb[2].mxu0  ;;  %v430_v3 = vpop.f32.mrb[2].mxu1 }
 0x14d   : > { %v509_v4 = vmul.f32 %v1287_v56, %v465_v60  ;;  %v525_v5 = vmul.f32 %v1287_v56, %v481_v62  ;;  %v467_v6 = vmax.f32 %v390_v2, 0.0  ;;  %v392_v7 = vpop.f32.mrb[3].mxu0  ;;  %v483_v8 = vmax.f32 %v430_v3, 0.0  ;;  %v432_v9 = vpop.f32.mrb[3].mxu1 }
 0x14e   : > { %v510_v10 = vmul.f32 %v1289_v58, %v466_v0  ;;  %v526_v11 = vmul.f32 %v1289_v58, %v482_v1  ;;  %v468_v12 = vmax.f32 %v392_v7, 0.0  ;;  %v484_v14 = vmax.f32 %v432_v9, 0.0 }
 0x14f   : > { %v511_v15 = vmul.f32 %v1287_v56, %v467_v6  ;;  %v527_v16 = vmul.f32 %v1287_v56, %v483_v8  ;;  %v607_v6 = vmul.f32 %v1231_v13, %v1254_v34  ;;  %v608_v34 = vmul.f32 %v1231_v13, %v1263_v39 }
 0x150   : > { %v512_v17 = vmul.f32 %v1289_v58, %v468_v12  ;;  %v528_v18 = vmul.f32 %v1289_v58, %v484_v14  ;;  %v541_v19 = vadd.f32 %v510_v10, %v509_v4  ;;  %v565_v20 = vadd.f32 %v526_v11, %v525_v5 }
 0x152   : > { %542 = vadd.xlane.f32.xlu0 %v541_v19  ;;  %v396_v21 = vpop.f32.mrb[4].mxu0  ;;  %v544_v22 = vadd.f32 %v512_v17, %v511_v15  ;;  %v436_v23 = vpop.f32.mrb[4].mxu1  ;;  %v568_v24 = vadd.f32 %v528_v18, %v527_v16 }
 0x153   : > { %v469_v25 = vmax.f32 %v396_v21, 0.0  ;;  %v398_v27 = vpop.f32.mrb[5].mxu0  ;;  %v485_v28 = vmax.f32 %v436_v23, 0.0  ;;  %v438_v29 = vpop.f32.mrb[5].mxu1 }
 0x154   : > { %545 = vadd.xlane.f32.xlu1 %v544_v22  ;;  %v470_v30 = vmax.f32 %v398_v27, 0.0  ;;  %v400_v31 = vpop.f32.mrb[6].mxu0  ;;  %v486_v32 = vmax.f32 %v438_v29, 0.0  ;;  %v440_v35 = vpop.f32.mrb[6].mxu1 }
 0x155   : > { %v513_v37 = vmul.f32 %v1287_v56, %v469_v25  ;;  %v471_v38 = vmax.f32 %v400_v31, 0.0  ;;  %v402_v41 = vpop.f32.mrb[7].mxu0  ;;  %v529_v42 = vmul.f32 %v1287_v56, %v485_v28  ;;  %v487_v43 = vmax.f32 %v440_v35, 0.0  ;;  %v442_v46 = vpop.f32.mrb[7].mxu1 }
 0x156   : > { %v514_v47 = vmul.f32 %v1289_v58, %v470_v30  ;;  %566 = vadd.xlane.f32.xlu0 %v565_v20  ;;  %v472_v48 = vmax.f32 %v402_v41, 0.0  ;;  %v530_v49 = vmul.f32 %v1289_v58, %v486_v32  ;;  %v488_v50 = vmax.f32 %v442_v46, 0.0 }
 0x157   : > { %v515_v51 = vmul.f32 %v1287_v56, %v471_v38  ;;  %v531_v52 = vmul.f32 %v1287_v56, %v487_v43  ;;  %v609_v38 = vmul.f32 %v1231_v13, %v1266_v40  ;;  %v610_v40 = vmul.f32 %v1231_v13, %v1274_v44  ;;  %v615_v44 = vpop.xlane.xlu1 %614 }
 0x158   : > { %v516_v53 = vmul.f32 %v1289_v58, %v472_v48  ;;  %v532_v54 = vmul.f32 %v1289_v58, %v488_v50  ;;  %630 = vadd.xlane.f32.xlu1 %v605_v36  ;;  %v547_v55 = vadd.f32 %v514_v47, %v513_v37  ;;  %v571_v57 = vadd.f32 %v530_v49, %v529_v42 }
 0x15a   : > { %569 = vadd.xlane.f32.xlu0 %v568_v24  ;;  %v406_v59 = vpop.f32.mrb[8].mxu0  ;;  %v550_v60 = vadd.f32 %v516_v53, %v515_v51  ;;  %v446_v61 = vpop.f32.mrb[8].mxu1  ;;  %v1311_v62 = vadd.f32 %v532_v54, %v531_v52 }
 0x15b   : > { %v473_v63 = vmax.f32 %v406_v59, 0.0  ;;  %v408_v0 = vpop.f32.mrb[9].mxu0  ;;  %v489_v1 = vmax.f32 %v446_v61, 0.0  ;;  %v448_v2 = vpop.f32.mrb[9].mxu1 }
 0x15c   : > { %632 = vadd.xlane.f32.xlu1 %v606_v26  ;;  %v474_v3 = vmax.f32 %v408_v0, 0.0  ;;  %v410_v33 = vpop.f32.mrb[10].mxu0  ;;  %v490_v4 = vmax.f32 %v448_v2, 0.0  ;;  %v450_v5 = vpop.f32.mrb[10].mxu1 }
 0x15d   : > { %v517_v7 = vmul.f32 %v1287_v56, %v473_v63  ;;  %v475_v8 = vmax.f32 %v410_v33, 0.0  ;;  %v412_v9 = vpop.f32.mrb[11].mxu0  ;;  %v533_v10 = vmul.f32 %v1287_v56, %v489_v1  ;;  %v491_v11 = vmax.f32 %v450_v5, 0.0  ;;  %v452_v12 = vpop.f32.mrb[11].mxu1 }
 0x15e   : > { %548 = vadd.xlane.f32.xlu0 %v547_v55  ;;  %v518_v14 = vmul.f32 %v1289_v58, %v474_v3  ;;  %v476_v15 = vmax.f32 %v412_v9, 0.0  ;;  %v534_v16 = vmul.f32 %v1289_v58, %v490_v4  ;;  %v492_v17 = vmax.f32 %v452_v12, 0.0  ;;  %v613_v3 = vpop.xlane.xlu0 %612 }
 0x15f   : > { %v519_v18 = vmul.f32 %v1287_v56, %v475_v8  ;;  %v535_v19 = vmul.f32 %v1287_v56, %v491_v11  ;;  %v611_v63 = vmul.f32 %v1231_v13, %v1277_v45 }
 0x160   : > { %v520_v20 = vmul.f32 %v1289_v58, %v476_v15  ;;  %v536_v21 = vmul.f32 %v1289_v58, %v492_v17  ;;  %634 = vadd.xlane.f32.xlu1 %v607_v6  ;;  %v553_v22 = vadd.f32 %v518_v14, %v517_v7  ;;  %v577_v23 = vadd.f32 %v534_v16, %v533_v10 }
 0x162   : > { %572 = vadd.xlane.f32.xlu0 %v571_v57  ;;  %v416_v24 = vpop.f32.mrb[12].mxu0  ;;  %v556_v25 = vadd.f32 %v520_v20, %v519_v18  ;;  %v456_v27 = vpop.f32.mrb[12].mxu1  ;;  %v580_v28 = vadd.f32 %v536_v21, %v535_v19 }
 0x163   : > { %v477_v29 = vmax.f32 %v416_v24, 0.0  ;;  %v418_v30 = vpop.f32.mrb[13].mxu0  ;;  %v493_v31 = vmax.f32 %v456_v27, 0.0  ;;  %v458_v32 = vpop.f32.mrb[13].mxu1 }
 0x164   : > { %636 = vadd.xlane.f32.xlu1 %v608_v34  ;;  %v478_v35 = vmax.f32 %v418_v30, 0.0  ;;  %v420_v36 = vpop.f32.mrb[14].mxu0  ;;  %v494_v39 = vmax.f32 %v458_v32, 0.0  ;;  %v460_v37 = vpop.f32.mrb[14].mxu1 }
 0x165   : > { %v521_v41 = vmul.f32 %v1287_v56, %v477_v29  ;;  %v479_v42 = vmax.f32 %v420_v36, 0.0  ;;  %v422_v43 = vpop.f32.mrb[15].mxu0  ;;  %v537_v46 = vmul.f32 %v1287_v56, %v493_v31  ;;  %v495_v47 = vmax.f32 %v460_v37, 0.0  ;;  %v462_v48 = vpop.f32.mrb[15].mxu1 }
 0x166   : > { %551 = vadd.xlane.f32.xlu0 %v550_v60  ;;  %v522_v49 = vmul.f32 %v1289_v58, %v478_v35  ;;  %v480_v50 = vmax.f32 %v422_v43, 0.0  ;;  %v538_v51 = vmul.f32 %v1289_v58, %v494_v39  ;;  %v496_v52 = vmax.f32 %v462_v48, 0.0 }
 0x167   : > { %v523_v26 = vmul.f32 %v1287_v56, %v479_v42  ;;  %v539_v53 = vmul.f32 %v1287_v56, %v495_v47  ;;  %v617_v56 = vpop.xlane.xlu1 %616 }
 0x168   : > { %v524_v54 = vmul.f32 %v1289_v58, %v480_v50  ;;  %v540_v55 = vmul.f32 %v1289_v58, %v496_v52  ;;  %638 = vadd.xlane.f32.xlu1 %v609_v38  ;;  %v559_v57 = vadd.f32 %v522_v49, %v521_v41  ;;  %v583_v59 = vadd.f32 %v538_v51, %v537_v46 }
 0x16a   : > { %575 = vadd.xlane.f32.xlu0 %v1311_v62  ;;  %v562_v60 = vadd.f32 %v524_v54, %v523_v26  ;;  %v586_v61 = vadd.f32 %v540_v55, %v539_v53 }
 0x16b   : > { %v619_v58 = vpop.xlane.xlu1 %618 }
 0x16c   : > { %640 = vadd.xlane.f32.xlu1 %v610_v40 }
 0x16e   : > { %554 = vadd.xlane.f32.xlu0 %v553_v22 }
 0x16f   : > { %v621_v0 = vpop.xlane.xlu1 %620 }
 0x170   : > { %642 = vadd.xlane.f32.xlu1 %v611_v63 }
 0x172   : > { %578 = vadd.xlane.f32.xlu0 %v577_v23 }
 0x173   : > { %v623_v62 = vpop.xlane.xlu1 %622 }
 0x176   : > { %557 = vadd.xlane.f32.xlu0 %v556_v25 }
 0x177   : > { %v625_v1 = vpop.xlane.xlu1 %624 }
 0x17a   : > { %581 = vadd.xlane.f32.xlu0 %v580_v28 }
 0x17b   : > { %v627_v2 = vpop.xlane.xlu1 %626 }
 0x17e   : > { %560 = vadd.xlane.f32.xlu0 %v559_v57 }
 0x17f   : > { %v629_v33 = vpop.xlane.xlu1 %628 }
 0x182   : > { %584 = vadd.xlane.f32.xlu0 %v583_v59 }
 0x186   : > { %563 = vadd.xlane.f32.xlu0 %v562_v60 }
 0x18a   : > { %587 = vadd.xlane.f32.xlu0 %v586_v61 }
 0x1df   : > { %v543_v4 = vpop.xlane.xlu0 %542 }
 0x1e0   : > { %v644_v13 = vadd.f32 %v613_v3, %v543_v4 }
 0x1e1   : > { %v546_v45 = vpop.xlane.xlu1 %545 }
 0x1e2   : > { %660 = vxpose.xlu0.b32.start [1/16] (narrow) %v644_v13, 8  ;;  %v645_v6 = vadd.f32 %v615_v44, %v546_v45 }
 0x1e3   : > { %v567_v5 = vpop.xlane.xlu0 %566 }
 0x1e4   : > { %v652_v25 = vadd.f32 %v629_v33, %v567_v5 }
 0x1e5   : > { %v631_v27 = vpop.xlane.xlu1 %630 }
 0x1e6   : > { %661 = vxpose.xlu0.b32.cont [2/16] (narrow) %v645_v6, 8 }
 0x1e7   : > { %v570_v7 = vpop.xlane.xlu0 %569 }
 0x1e8   : > { %v653_v28 = vadd.f32 %v631_v27, %v570_v7 }
 0x1e9   : > { %v633_v29 = vpop.xlane.xlu1 %632 }
 0x1eb   : > { %v549_v8 = vpop.xlane.xlu0 %548 }
 0x1ec   : > { %v646_v9 = vadd.f32 %v617_v56, %v549_v8 }
 0x1ed   : > { %v635_v31 = vpop.xlane.xlu1 %634 }
 0x1ee   : > { %662 = vxpose.xlu0.b32.cont [3/16] (narrow) %v646_v9, 8 }
 0x1ef   : > { %v573_v10 = vpop.xlane.xlu0 %572 }
 0x1f0   : > { %v654_v30 = vadd.f32 %v633_v29, %v573_v10 }
 0x1f1   : > { %v637_v35 = vpop.xlane.xlu1 %636 }
 0x1f3   : > { %v552_v11 = vpop.xlane.xlu0 %551 }
 0x1f4   : > { %v647_v12 = vadd.f32 %v619_v58, %v552_v11 }
 0x1f5   : > { %v639_v39 = vpop.xlane.xlu1 %638 }
 0x1f6   : > { %663 = vxpose.xlu0.b32.cont [4/16] (narrow) %v647_v12, 8 }
 0x1f7   : > { %v576_v14 = vpop.xlane.xlu0 %575 }
 0x1f8   : > { %v655_v32 = vadd.f32 %v635_v31, %v576_v14 }
 0x1f9   : > { %v641_v38 = vpop.xlane.xlu1 %640 }
 0x1fb   : > { %v555_v15 = vpop.xlane.xlu0 %554 }
 0x1fc   : > { %v648_v16 = vadd.f32 %v621_v0, %v555_v15 }
 0x1fd   : > { %v643_v42 = vpop.xlane.xlu1 %642 }
 0x1fe   : > { %664 = vxpose.xlu0.b32.cont [5/16] (narrow) %v648_v16, 8 }
 0x1ff   : > { %v579_v17 = vpop.xlane.xlu0 %578 }
 0x200   : > { %v656_v36 = vadd.f32 %v637_v35, %v579_v17 }
 0x203   : > { %v558_v18 = vpop.xlane.xlu0 %557 }
 0x204   : > { %v649_v19 = vadd.f32 %v623_v62, %v558_v18 }
 0x206   : > { %665 = vxpose.xlu0.b32.cont [6/16] (narrow) %v649_v19, 8 }
 0x207   : > { %v582_v34 = vpop.xlane.xlu0 %581 }
 0x208   : > { %v657_v37 = vadd.f32 %v639_v39, %v582_v34 }
 0x20b   : > { %v561_v20 = vpop.xlane.xlu0 %560 }
 0x20c   : > { %v650_v21 = vadd.f32 %v625_v1, %v561_v20 }
 0x20e   : > { %666 = vxpose.xlu0.b32.cont [7/16] (narrow) %v650_v21, 8 }
 0x20f   : > { %v585_v22 = vpop.xlane.xlu0 %584 }
 0x210   : > { %v658_v41 = vadd.f32 %v641_v38, %v585_v22 }
 0x213   : > { %v564_v23 = vpop.xlane.xlu0 %563 }
 0x214   : > { %v651_v24 = vadd.f32 %v627_v2, %v564_v23 }
 0x216   : > { %667 = vxpose.xlu0.b32.cont [8/16] (narrow) %v651_v24, 8 }
 0x217   : > { %v588_v43 = vpop.xlane.xlu0 %587 }
 0x218   : > { %v659_v46 = vadd.f32 %v643_v42, %v588_v43 }
 0x21a   : > { %668 = vxpose.xlu0.b32.cont [9/16] (narrow) %v652_v25, 8 }
 0x21e   : > { %669 = vxpose.xlu0.b32.cont [10/16] (narrow) %v653_v28, 8 }
 0x222   : > { %670 = vxpose.xlu0.b32.cont [11/16] (narrow) %v654_v30, 8 }
 0x226   : > { %671 = vxpose.xlu0.b32.cont [12/16] (narrow) %v655_v32, 8 }
 0x22a   : > { %672 = vxpose.xlu0.b32.cont [13/16] (narrow) %v656_v36, 8 }
 0x22e   : > { %673 = vxpose.xlu0.b32.cont [14/16] (narrow) %v657_v37, 8 }
 0x232   : > { %674 = vxpose.xlu0.b32.cont [15/16] (narrow) %v658_v41, 8 }
 0x236   : > { %675 = vxpose.xlu0.b32.end [16/16] (narrow) %v659_v46, 8 }
 0x27a   : > { %v676_v47 = vpop.trf.xlu0 }
 0x27b   : > { %692 = vst [vmem:[%s229_s9] sm:$0x1] %v676_v47 }
 0x27c   : > { %984 = shalt.err (!%p981_p7)
}
 0x27d   : > { %s985_s11 = scalar_lea.hbm %s1347_s26, 16  ;;  %s989_s21 = scalar_lea.hbm %s1392_s4, 64 }
 0x27e   : > { %p986_p9 = scmp.ne.s32.totalorder %s1347_s26, %s985_s11  ;;  %p990_p5 = scmp.lt.u32.totalorder %s1347_s26, %s1392_s4 }
 0x27f   : > { %p991_p10 = scmp.lt.u32.totalorder %s989_s21, %s985_s11  ;;  %p993_p4 = scmp.lt.u32.totalorder %s985_s11, %s1347_s26 }
 0x280   : > { %p987_p1 = pnand %p986_p9, %p1160_p12 }
 0x281   : > { %p992_p2 = por %p991_p10, %p990_p5 }
 0x282   : > { %p988_p0 = pneg %p987_p1 }
 0x283   : > { %p994_p6 = por %p993_p4, %p992_p2 }
 0x285   : > { %p995_p8 = pnand %p994_p6, %p988_p0 }
 0x287   : > { %998 = shalt.err (!%p995_p8)
}
 0x288   : > { %835 = dma.vmem_to_hbm [thread:$0]  (%p1160_p12), %s1342_s28, 16, %s1347_s26, %s694_s8  }
 0x289 PF: > { %p852_p11 = scmp.ge.s32.totalorder %s1041_s18, 2  ;;  %s718_s13 = sand.u32 1, %s1029_s15  }
 0x28a   : > { %p1407_p13 = scmp.ne.s32.totalorder %s1397_s22, 0  ;;  %s719_s9 = scalar_lea.sflag [#allocation4], %s718_s13 }
 0x28c   : > { %p846_p3 = pnand %p852_p11, %p1407_p13 }
 0x28e   : > { %1024 = dma.done.wait (!%p846_p3), %s719_s9, 16  }
 0x28f   : > { %1026 = vsyncadd (!%p846_p3), %s719_s9, 4294967280  ;;  %p18_p7 = scmp.ge.s32.totalorder %s1127_s27, 6   ;;  %s1408_s15 = smov %s1033_s16 }
 0x290   : > { %s1409_s16 = smov %s1037_s17  ;;  %s1410_s17 = smov %s1156_s24 }
 0x291   : > { %s1411_s18 = smov %s1127_s27  ;;  %20 = sbr.rel (!%p18_p7) target bundleno = 6 (0x6), region = 85 }
 0x298   :  { %723 = vsyncpa [#allocation3], 1 }
 0x299   :  { %725 = vsyncpa [#allocation3 + $0x1], 1 }
 0x29a   :  { %726 = vsyncpa [#allocation6], 1 }
 0x29b   :  { %727 = vsyncpa [#allocation4], 1 }
 0x29c   :  { %729 = vsyncpa [#allocation4 + $0x1], 1 }

</bundles_post_ra>
